<compile_context>
chip_gen: v5e
topology: v5e:2x2
jax: 0.10.0
libtpu: 0.0.40
codegen_flags: <defaults>
</compile_context>

<pallas_src>
import functools

import jax
import jax.numpy as jnp
from jax.experimental import pallas as pl
from jax.experimental.pallas import tpu as pltpu

HID0 = 128
HID1 = 256


def _dqn_kernel(x_ref,
                w0_ref, b0_ref,
                w1_ref, b1_ref,
                wq_ref, bq_ref,
                q_ref, *, output_dim):
    x = x_ref[...]

    # fc: Linear -> ReLU -> Linear -> ReLU  (MXU matmuls, f32 accumulation)
    h = jnp.dot(x, w0_ref[...], preferred_element_type=jnp.float32) + b0_ref[...]
    h = jnp.maximum(h, 0.0)
    h = jnp.dot(h, w1_ref[...], preferred_element_type=jnp.float32) + b1_ref[...]
    h = jnp.maximum(h, 0.0)

    # Fused heads: ONE matmul over the concatenated (256, 2*output_dim) weight.
    logits = jnp.dot(h, wq_ref[...], preferred_element_type=jnp.float32) + bq_ref[...]

    def softmax(l):
        m = jnp.max(l, axis=-1, keepdims=True)
        e = jnp.exp(l - m)
        # Exact divide: keeps sum(softmax) == 1 to fp32 rounding. This is a
        # tiny (TM, output_dim) elementwise op, far off the MXU critical path.
        return e / jnp.sum(e, axis=-1, keepdims=True)

    q1 = softmax(logits[:, :output_dim])
    q2 = softmax(logits[:, output_dim:])
    # Single lane-dense store of the packed (TM, 2*output_dim) output slab.
    q_ref[...] = jnp.concatenate([q1, q2], axis=-1).astype(q_ref.dtype)


def dqn_forward(state, params, *, tm_max=256):
    """state: (B, input_dim) f32 -> (qvals1, qvals2), each (B, output_dim).

    tm_max: batch tile. 256 suits v6e/v7x MXU; 128 is also fine on v5e.
    """
    B, input_dim = state.shape
    D = params["wq1"].shape[1]

    # Host-side head fusion (pure layout work, done once per call).
    wq = jnp.concatenate([params["wq1"], params["wq2"]], axis=1)   # (256, 2D)
    bq = jnp.concatenate([params["bq1"], params["bq2"]], axis=1)   # (1, 2D)

    # Batch tiling: single full-array tile for small B (no (8,128) constraint
    # since the block equals the full array), otherwise TM=tm_max tiles with
    # zero-padding of the batch to a multiple of TM.
    if B <= tm_max:
        TM, B_pad = B, B
        x = state
    else:
        TM = tm_max
        B_pad = ((B + TM - 1) // TM) * TM
        x = state if B_pad == B else jnp.pad(state, ((0, B_pad - B), (0, 0)))

    grid = (B_pad // TM,)

    # x / output tiles move with the grid; weights & biases are pinned to the
    # same block every step -> stay resident in VMEM (no re-DMA).
    x_spec = pl.BlockSpec((TM, input_dim), lambda i: (i, 0))
    out_spec = pl.BlockSpec((TM, 2 * D), lambda i: (i, 0))

    def const_spec(arr):
        return pl.BlockSpec(arr.shape, lambda i: (0, 0))

    in_specs = [
        x_spec,
        const_spec(params["w0"]), const_spec(params["b0"]),
        const_spec(params["w1"]), const_spec(params["b1"]),
        const_spec(wq), const_spec(bq),
    ]

    flops = 2 * B_pad * (input_dim * HID0 + HID0 * HID1 + HID1 * 2 * D)
    transcendentals = 2 * B_pad * D                      # exps
    bytes_accessed = 4 * (B_pad * input_dim
                          + params["w0"].size + params["b0"].size
                          + params["w1"].size + params["b1"].size
                          + wq.size + bq.size
                          + B_pad * 2 * D)

    q = pl.pallas_call(
        functools.partial(_dqn_kernel, output_dim=D),
        grid=grid,
        out_shape=jax.ShapeDtypeStruct((B_pad, 2 * D), jnp.float32),
        in_specs=in_specs,
        out_specs=out_spec,
        compiler_params=pltpu.CompilerParams(
            dimension_semantics=("parallel",)),
        cost_estimate=pl.CostEstimate(
            flops=int(flops),
            transcendentals=int(transcendentals),
            bytes_accessed=int(bytes_accessed)),
    )(x, params["w0"], params["b0"], params["w1"], params["b1"], wq, bq)

    # Unpack the fused output slab; drop any batch padding.
    return q[:B, :D], q[:B, D:]


def init_dqn_params(key, input_dim, output_dim):
    """Deterministic init mimicking PyTorch Linear default (U[-1/sqrt(fan_in), +])."""
    def linear(key, fan_in, fan_out):
        kw, kb = jax.random.split(key)
        bound = 1.0 / jnp.sqrt(fan_in)
        w = jax.random.uniform(kw, (fan_in, fan_out), jnp.float32, -bound, bound)
        b = jax.random.uniform(kb, (1, fan_out), jnp.float32, -bound, bound)
        return w, b

    k0, k1, k2, k3 = jax.random.split(key, 4)
    w0, b0 = linear(k0, input_dim, HID0)
    w1, b1 = linear(k1, HID0, HID1)
    wq1, bq1 = linear(k2, HID1, output_dim)
    wq2, bq2 = linear(k3, HID1, output_dim)
    return dict(w0=w0, b0=b0, w1=w1, b1=b1,
                wq1=wq1, bq1=bq1, wq2=wq2, bq2=bq2)


def dqn_reference(state, params):
    """Pure-JAX reference for validation."""
    h = jnp.maximum(state @ params["w0"] + params["b0"], 0.0)
    h = jnp.maximum(h @ params["w1"] + params["b1"], 0.0)
    q1 = jax.nn.softmax(h @ params["wq1"] + params["bq1"], axis=-1)
    q2 = jax.nn.softmax(h @ params["wq2"] + params["bq2"], axis=-1)
    return q1, q2


if __name__ == "__main__":
    key = jax.random.PRNGKey(0)
    k_params, k_state, k_big = jax.random.split(key, 3)

    input_dim = 32
    output_dim = 8
    params = init_dqn_params(k_params, input_dim, output_dim)

    # Small (action-selection sized) batch: single tile, grid of 1.
    batch = 2
    state = jax.random.normal(k_state, (batch, input_dim), jnp.float32)
    q1, q2 = dqn_forward(state, params)
    jax.block_until_ready((q1, q2))

    r1, r2 = dqn_reference(state, params)
    assert q1.shape == (batch, output_dim) and q2.shape == (batch, output_dim)
    assert jnp.allclose(q1, r1, atol=1e-3), "qvals1 mismatch vs reference"
    assert jnp.allclose(q2, r2, atol=1e-3), "qvals2 mismatch vs reference"
    assert jnp.allclose(jnp.sum(q1, axis=-1), 1.0, atol=1e-3)
    assert jnp.allclose(jnp.sum(q2, axis=-1), 1.0, atol=1e-3)

    # Training-sized batch (non-multiple of the tile): exercises the batch grid
    # + zero-padding path (300 -> padded to 512, grid of 2 x TM=256).
    big = jax.random.normal(k_big, (300, input_dim), jnp.float32)
    bq1_, bq2_ = dqn_forward(big, params)
    jax.block_until_ready((bq1_, bq2_))
    rb1, rb2 = dqn_reference(big, params)
    assert bq1_.shape == (300, output_dim) and bq2_.shape == (300, output_dim)
    assert jnp.allclose(bq1_, rb1, atol=1e-3), "large-batch qvals1 mismatch"
    assert jnp.allclose(bq2_, rb2, atol=1e-3), "large-batch qvals2 mismatch"
    assert jnp.allclose(jnp.sum(bq1_, axis=-1), 1.0, atol=1e-3)
    assert jnp.allclose(jnp.sum(bq2_, axis=-1), 1.0, atol=1e-3)

    print("KERNEL_OK")
</pallas_src>

<mosaic_0001>
module attributes {stable_mosaic.version = 11 : i64} {
  func.func @_dqn_kernel(%arg0: i32, %arg1: memref<2x32xf32, #tpu.memory_space<vmem>>, %arg2: memref<32x128xf32, #tpu.memory_space<vmem>>, %arg3: memref<1x128xf32, #tpu.memory_space<vmem>>, %arg4: memref<128x256xf32, #tpu.memory_space<vmem>>, %arg5: memref<1x256xf32, #tpu.memory_space<vmem>>, %arg6: memref<256x16xf32, #tpu.memory_space<vmem>>, %arg7: memref<1x16xf32, #tpu.memory_space<vmem>>, %arg8: memref<2x16xf32, #tpu.memory_space<vmem>>) attributes {dimension_semantics = [#tpu.dimension_semantics<parallel>], iteration_bounds = array<i64: 1>, scalar_prefetch = 0 : i64, scratch_operands = 0 : i64, tpu.core_type = #tpu.core_type<tc>, window_params = [{transform_indices = @transform_0, window_bounds = array<i64: 2, 32>}, {pipeline_mode = #tpu.pipeline_mode<synchronous>, transform_indices = @transform_1, window_bounds = array<i64: 32, 128>}, {pipeline_mode = #tpu.pipeline_mode<synchronous>, transform_indices = @transform_2, window_bounds = array<i64: 1, 128>}, {pipeline_mode = #tpu.pipeline_mode<synchronous>, transform_indices = @transform_3, window_bounds = array<i64: 128, 256>}, {pipeline_mode = #tpu.pipeline_mode<synchronous>, transform_indices = @transform_4, window_bounds = array<i64: 1, 256>}, {pipeline_mode = #tpu.pipeline_mode<synchronous>, transform_indices = @transform_5, window_bounds = array<i64: 256, 16>}, {pipeline_mode = #tpu.pipeline_mode<synchronous>, transform_indices = @transform_6, window_bounds = array<i64: 1, 16>}, {transform_indices = @transform_7, window_bounds = array<i64: 2, 16>}]} {
    %c0 = arith.constant 0 : index
    %c0_0 = arith.constant 0 : index
    %0 = vector.load %arg1[%c0, %c0_0] : memref<2x32xf32, #tpu.memory_space<vmem>>, vector<2x32xf32>
    %c0_1 = arith.constant 0 : index
    %c0_2 = arith.constant 0 : index
    %1 = vector.load %arg2[%c0_1, %c0_2] : memref<32x128xf32, #tpu.memory_space<vmem>>, vector<32x128xf32>
    %cst = arith.constant dense<0.000000e+00> : vector<2x128xf32>
    %2 = tpu.matmul %0, %1, %cst {dimension_numbers = #tpu.dot_dimension_numbers<[1], [0], [0], [1], [0, 0, 1, 1], [], []>} : vector<2x32xf32>, vector<32x128xf32>, vector<2x128xf32> -> vector<2x128xf32>
    %c0_3 = arith.constant 0 : index
    %c0_4 = arith.constant 0 : index
    %3 = vector.load %arg3[%c0_3, %c0_4] : memref<1x128xf32, #tpu.memory_space<vmem>>, vector<1x128xf32>
    %4 = vector.broadcast %3 : vector<1x128xf32> to vector<2x128xf32>
    %5 = arith.addf %2, %4 : vector<2x128xf32>
    %cst_5 = arith.constant 0.000000e+00 : f32
    %6 = vector.broadcast %cst_5 : f32 to vector<2x128xf32>
    %7 = arith.maximumf %5, %6 : vector<2x128xf32>
    %c0_6 = arith.constant 0 : index
    %c0_7 = arith.constant 0 : index
    %8 = vector.load %arg4[%c0_6, %c0_7] : memref<128x256xf32, #tpu.memory_space<vmem>>, vector<128x256xf32>
    %cst_8 = arith.constant dense<0.000000e+00> : vector<2x256xf32>
    %9 = tpu.matmul %7, %8, %cst_8 {dimension_numbers = #tpu.dot_dimension_numbers<[1], [0], [0], [1], [0, 0, 1, 1], [], []>} : vector<2x128xf32>, vector<128x256xf32>, vector<2x256xf32> -> vector<2x256xf32>
    %c0_9 = arith.constant 0 : index
    %c0_10 = arith.constant 0 : index
    %10 = vector.load %arg5[%c0_9, %c0_10] : memref<1x256xf32, #tpu.memory_space<vmem>>, vector<1x256xf32>
    %11 = vector.broadcast %10 : vector<1x256xf32> to vector<2x256xf32>
    %12 = arith.addf %9, %11 : vector<2x256xf32>
    %cst_11 = arith.constant 0.000000e+00 : f32
    %13 = vector.broadcast %cst_11 : f32 to vector<2x256xf32>
    %14 = arith.maximumf %12, %13 : vector<2x256xf32>
    %c0_12 = arith.constant 0 : index
    %c0_13 = arith.constant 0 : index
    %15 = vector.load %arg6[%c0_12, %c0_13] : memref<256x16xf32, #tpu.memory_space<vmem>>, vector<256x16xf32>
    %cst_14 = arith.constant dense<0.000000e+00> : vector<2x16xf32>
    %16 = tpu.matmul %14, %15, %cst_14 {dimension_numbers = #tpu.dot_dimension_numbers<[1], [0], [0], [1], [0, 0, 1, 1], [], []>} : vector<2x256xf32>, vector<256x16xf32>, vector<2x16xf32> -> vector<2x16xf32>
    %c0_15 = arith.constant 0 : index
    %c0_16 = arith.constant 0 : index
    %17 = vector.load %arg7[%c0_15, %c0_16] : memref<1x16xf32, #tpu.memory_space<vmem>>, vector<1x16xf32>
    %18 = vector.broadcast %17 : vector<1x16xf32> to vector<2x16xf32>
    %19 = arith.addf %16, %18 : vector<2x16xf32>
    %20 = vector.extract_strided_slice %19 {offsets = [0, 0], sizes = [2, 8], strides = [1, 1]} : vector<2x16xf32> to vector<2x8xf32>
    %cst_17 = arith.constant dense<0xFF800000> : vector<2xf32>
    %21 = vector.multi_reduction <maximumf>, %20, %cst_17 [1] : vector<2x8xf32> to vector<2xf32>
    %22 = vector.shape_cast %21 : vector<2xf32> to vector<2x1xf32>
    %23 = vector.broadcast %22 : vector<2x1xf32> to vector<2x8xf32>
    %24 = arith.subf %20, %23 : vector<2x8xf32>
    %25 = math.exp %24 : vector<2x8xf32>
    %cst_18 = arith.constant dense<0.000000e+00> : vector<2xf32>
    %26 = vector.multi_reduction <add>, %25, %cst_18 [1] : vector<2x8xf32> to vector<2xf32>
    %27 = vector.shape_cast %26 : vector<2xf32> to vector<2x1xf32>
    %28 = vector.broadcast %27 : vector<2x1xf32> to vector<2x8xf32>
    %29 = arith.divf %25, %28 : vector<2x8xf32>
    %30 = vector.extract_strided_slice %19 {offsets = [0, 8], sizes = [2, 8], strides = [1, 1]} : vector<2x16xf32> to vector<2x8xf32>
    %cst_19 = arith.constant dense<0xFF800000> : vector<2xf32>
    %31 = vector.multi_reduction <maximumf>, %30, %cst_19 [1] : vector<2x8xf32> to vector<2xf32>
    %32 = vector.shape_cast %31 : vector<2xf32> to vector<2x1xf32>
    %33 = vector.broadcast %32 : vector<2x1xf32> to vector<2x8xf32>
    %34 = arith.subf %30, %33 : vector<2x8xf32>
    %35 = math.exp %34 : vector<2x8xf32>
    %cst_20 = arith.constant dense<0.000000e+00> : vector<2xf32>
    %36 = vector.multi_reduction <add>, %35, %cst_20 [1] : vector<2x8xf32> to vector<2xf32>
    %37 = vector.shape_cast %36 : vector<2xf32> to vector<2x1xf32>
    %38 = vector.broadcast %37 : vector<2x1xf32> to vector<2x8xf32>
    %39 = arith.divf %35, %38 : vector<2x8xf32>
    %40 = tpu.concatenate %29, %39 in 1 : vector<2x8xf32>, vector<2x8xf32> -> vector<2x16xf32>
    %c0_21 = arith.constant 0 : index
    %c0_22 = arith.constant 0 : index
    %41 = vector.load %arg8[%c0_21, %c0_22] : memref<2x16xf32, #tpu.memory_space<vmem>>, vector<2x16xf32>
    tpu.vector_store %arg8[%c0_21, %c0_22], %40 {strides = array<i32>} : memref<2x16xf32, #tpu.memory_space<vmem>>, vector<2x16xf32>,
    return
  }
  func.func @transform_0(%arg0: i32) -> (i32, i32) {
    %c0_i32 = arith.constant 0 : i32
    %c0_i32_0 = arith.constant 0 : i32
    return %arg0, %c0_i32 : i32, i32
  }
  func.func @transform_1(%arg0: i32) -> (i32, i32) {
    %c0_i32 = arith.constant 0 : i32
    %c0_i32_0 = arith.constant 0 : i32
    %c0_i32_1 = arith.constant 0 : i32
    return %c0_i32, %c0_i32_0 : i32, i32
  }
  func.func @transform_2(%arg0: i32) -> (i32, i32) {
    %c0_i32 = arith.constant 0 : i32
    %c0_i32_0 = arith.constant 0 : i32
    %c0_i32_1 = arith.constant 0 : i32
    return %c0_i32, %c0_i32_0 : i32, i32
  }
  func.func @transform_3(%arg0: i32) -> (i32, i32) {
    %c0_i32 = arith.constant 0 : i32
    %c0_i32_0 = arith.constant 0 : i32
    %c0_i32_1 = arith.constant 0 : i32
    return %c0_i32, %c0_i32_0 : i32, i32
  }
  func.func @transform_4(%arg0: i32) -> (i32, i32) {
    %c0_i32 = arith.constant 0 : i32
    %c0_i32_0 = arith.constant 0 : i32
    %c0_i32_1 = arith.constant 0 : i32
    return %c0_i32, %c0_i32_0 : i32, i32
  }
  func.func @transform_5(%arg0: i32) -> (i32, i32) {
    %c0_i32 = arith.constant 0 : i32
    %c0_i32_0 = arith.constant 0 : i32
    %c0_i32_1 = arith.constant 0 : i32
    return %c0_i32, %c0_i32_0 : i32, i32
  }
  func.func @transform_6(%arg0: i32) -> (i32, i32) {
    %c0_i32 = arith.constant 0 : i32
    %c0_i32_0 = arith.constant 0 : i32
    %c0_i32_1 = arith.constant 0 : i32
    return %c0_i32, %c0_i32_0 : i32, i32
  }
  func.func @transform_7(%arg0: i32) -> (i32, i32) {
    %c0_i32 = arith.constant 0 : i32
    %c0_i32_0 = arith.constant 0 : i32
    return %arg0, %c0_i32 : i32, i32
  }
}

</mosaic_0001>

<bundles_post_ra>
// kernel: tpu_custom_call.1
= control target key start
LH: loop header
LB: loop body
LE: loop exit
PB: predicated region body
PF: predicated region fallthrough
CT: control target
= control target key end

     0   :  { %12 = vsyncpa [#allocation3], 0  ;;  %s680_s0 = inlined_call_operand.vmem [shape: f32[2,32], index: 0, kind: input, shape index: {}]   ;;  %s681_s1 = inlined_call_operand.vmem [shape: f32[32,128], index: 1, kind: input, shape index: {}]   ;;  %s682_s2 = inlined_call_operand.hbm [shape: f32[1,128], index: 2, kind: input, shape index: {}]   ;;  %s683_s3 = inlined_call_operand.vmem [shape: f32[128,256], index: 3, kind: input, shape index: {}]   ;;  %s684_s4 = inlined_call_operand.hbm [shape: f32[1,256], index: 4, kind: input, shape index: {}]   ;;  %s685_s5 = inlined_call_operand.vmem [shape: f32[256,16], index: 5, kind: input, shape index: {}]   ;;  %s686_s6 = inlined_call_operand.vmem [shape: f32[1,16], index: 6, kind: input, shape index: {}]   ;;  %s687_s7 = inlined_call_operand.hbm [shape: f32[2,16], index: 7, kind: output, shape index: {}]  }
   0x1   :  { %13 = vsyncpa [#allocation6], 0 }
   0x2   :  { %14 = vsyncpa [#allocation4], 0  ;;  %s24_s26 = sshll.u32 %s682_s2, 4  ;;  %s414_s27 = smov [#allocation2]   ;;  %s25_s26 = int_to_ptr.hbm [resolvable:$true] %s24_s26 }
   0x3   :  { %s26_s28 = sshll.u32 %s414_s27, 4  ;;  %s37_s8 = sshll.u32 %s684_s4, 4  ;;  %s27_s28 = int_to_ptr.vmem [resolvable:$true] %s26_s28  ;;  %s38_s8 = int_to_ptr.hbm [resolvable:$true] %s37_s8 }
   0x4   :  { %29 = dma.hbm_to_vmem [thread:$0]  %s25_s26, 16, %s27_s28, [#allocation3]  }
   0x5   :  { %s415_s9 = smov [#allocation5]  }
   0x6   :  { %s39_s10 = sshll.u32 %s415_s9, 4  ;;  %s40_s10 = int_to_ptr.vmem [resolvable:$true] %s39_s10 }
   0x7   :  { %42 = dma.hbm_to_vmem [thread:$0]  %s38_s8, 32, %s40_s10, [#allocation6]  }
   0x8   :  { %408 = dma.done.wait [#allocation3], 16  }
   0x9   :  { %409 = vsyncadd [#allocation3], 4294967280 }
   0xa   :  { %410 = dma.done.wait [#allocation6], 32  }
   0xb   :  { %411 = vsyncadd [#allocation6], 4294967264  ;;  %v59_v0 = vld [vmem:[%s681_s1 + $0x18] sm:$0xff]  ;;  %v58_v1 = vld [vmem:[%s681_s1 + $0x10] sm:$0xff]  ;;  %vm64_vm0 = vcmask 261120   ;;  %vm270_vm1 = vcmask 123968  }
   0xc   :  { %80 = vmatpush.msra.mxu0 %v59_v0  ;;  %v57_v2 = vld [vmem:[%s681_s1 + $0x8] sm:$0xff]  ;;  %v119_v3 = vld [vmem:[%s683_s3 + $0xf0] sm:$0xff]  ;;  %v120_v4 = vld [vmem:[%s683_s3 + $0xf8] sm:$0xff]  ;;  %vm245_vm2 = vcmask 58368   ;;  %s310_s14 = sshll.u32 %s687_s7, 4  ;;  %vm299_vm11 = vcmask 64512   ;;  %s311_s14 = int_to_ptr.hbm [resolvable:$true] %s310_s14 }
   0xd   :  { %127 = vmatpush.msra.mxu1 %v119_v3  ;;  %v117_v5 = vld [vmem:[%s683_s3 + $0xe0] sm:$0xff]  ;;  %v118_v6 = vld [vmem:[%s683_s3 + $0xe8] sm:$0xff]  ;;  %147 = vmatpush.msra.mxu2 %v120_v4  ;;  %v115_v7 = vld [vmem:[%s683_s3 + $0xd0] sm:$0xff]  ;;  %vm301_vm12 = vcmask 123904  }
   0xe   :  { %81 = vmatpush.msra.mxu0 %v58_v1  ;;  %v56_v8 = vld [vmem:[%s681_s1] sm:$0xff]  ;;  %v116_v9 = vld [vmem:[%s683_s3 + $0xd8] sm:$0xff]  ;;  %v114_v12 = vld [vmem:[%s683_s3 + $0xc8] sm:$0xff] }
   0xf   :  { %128 = vmatpush.msra.mxu1 %v117_v5  ;;  %v55_v10 = vld [vmem:[%s680_s0] sm:$0x3]  ;;  %148 = vmatpush.msra.mxu2 %v118_v6  ;;  %v111_v13 = vld [vmem:[%s683_s3 + $0xb0] sm:$0xff]  ;;  %v112_v14 = vld [vmem:[%s683_s3 + $0xb8] sm:$0xff] }
  0x10   :  { %82 = vmatpush.msra.mxu0 %v57_v2  ;;  %v113_v11 = vld [vmem:[%s683_s3 + $0xc0] sm:$0xff]  ;;  %v110_v16 = vld [vmem:[%s683_s3 + $0xa8] sm:$0xff]  ;;  %v107_v17 = vld [vmem:[%s683_s3 + $0x90] sm:$0xff] }
  0x11   :  { %129 = vmatpush.msra.mxu1 %v115_v7  ;;  %149 = vmatpush.msra.mxu2 %v116_v9  ;;  %v109_v15 = vld [vmem:[%s683_s3 + $0xa0] sm:$0xff]  ;;  %v108_v18 = vld [vmem:[%s683_s3 + $0x98] sm:$0xff]  ;;  %v106_v20 = vld [vmem:[%s683_s3 + $0x88] sm:$0xff] }
  0x12   :  { %83 = vmatpush.msra.mxu0 %v56_v8  ;;  %v105_v19 = vld [vmem:[%s683_s3 + $0x80] sm:$0xff]  ;;  %v103_v21 = vld [vmem:[%s683_s3 + $0x70] sm:$0xff]  ;;  %v104_v22 = vld [vmem:[%s683_s3 + $0x78] sm:$0xff] }
  0x13   :  { %321 = vmatmul.msk.f32.vlgmr.msra.gmra.mxu0 %vm64_vm0, %v55_v10  ;;  %130 = vmatpush.msra.mxu1 %v113_v11  ;;  %v101_v23 = vld [vmem:[%s683_s3 + $0x60] sm:$0xff]  ;;  %v102_v24 = vld [vmem:[%s683_s3 + $0x68] sm:$0xff]  ;;  %v99_v25 = vld [vmem:[%s683_s3 + $0x50] sm:$0xff] }
  0x14   :  { %150 = vmatpush.msra.mxu2 %v114_v12  ;;  %v100_v26 = vld [vmem:[%s683_s3 + $0x58] sm:$0xff]  ;;  %v97_v27 = vld [vmem:[%s683_s3 + $0x40] sm:$0xff]  ;;  %v98_v28 = vld [vmem:[%s683_s3 + $0x48] sm:$0xff] }
  0x15   :  { %131 = vmatpush.msra.mxu1 %v111_v13  ;;  %v95_v29 = vld [vmem:[%s683_s3 + $0x30] sm:$0xff]  ;;  %v96_v30 = vld [vmem:[%s683_s3 + $0x38] sm:$0xff]  ;;  %v93_v31 = vld [vmem:[%s683_s3 + $0x20] sm:$0xff] }
  0x16   :  { %151 = vmatpush.msra.mxu2 %v112_v14  ;;  %v94_v32 = vld [vmem:[%s683_s3 + $0x28] sm:$0xff]  ;;  %v91_v33 = vld [vmem:[%s683_s3 + $0x10] sm:$0xff]  ;;  %v92_v34 = vld [vmem:[%s683_s3 + $0x18] sm:$0xff] }
  0x17   :  { %132 = vmatpush.msra.mxu1 %v109_v15  ;;  %v89_v35 = vld [vmem:[%s683_s3] sm:$0xff]  ;;  %v90_v36 = vld [vmem:[%s683_s3 + $0x8] sm:$0xff]  ;;  %v184_v37 = vld [vmem:[%s685_s5 + $0x78] sm:$0xff] }
  0x18   :  { %152 = vmatpush.msra.mxu2 %v110_v16  ;;  %v183_v38 = vld [vmem:[%s685_s5 + $0x70] sm:$0xff]  ;;  %205 = vmatpush.msra.mxu3 %v184_v37  ;;  %v200_v39 = vld [vmem:[%s685_s5 + $0xf8] sm:$0xff]  ;;  %v182_v40 = vld [vmem:[%s685_s5 + $0x68] sm:$0xff] }
  0x19   :  { %133 = vmatpush.msra.mxu1 %v107_v17  ;;  %225 = vmatpush.msrb.mxu0 %v200_v39  ;;  %v199_v41 = vld [vmem:[%s685_s5 + $0xf0] sm:$0xff]  ;;  %v198_v42 = vld [vmem:[%s685_s5 + $0xe8] sm:$0xff]  ;;  %v181_v43 = vld [vmem:[%s685_s5 + $0x60] sm:$0xff] }
  0x1a   :  { %153 = vmatpush.msra.mxu2 %v108_v18  ;;  %206 = vmatpush.msra.mxu3 %v183_v38  ;;  %v197_v44 = vld [vmem:[%s685_s5 + $0xe0] sm:$0xff]  ;;  %v180_v45 = vld [vmem:[%s685_s5 + $0x58] sm:$0xff]  ;;  %v179_v47 = vld [vmem:[%s685_s5 + $0x50] sm:$0xff] }
  0x1b   :  { %134 = vmatpush.msra.mxu1 %v105_v19  ;;  %226 = vmatpush.msrb.mxu0 %v199_v41  ;;  %v196_v46 = vld [vmem:[%s685_s5 + $0xd8] sm:$0xff]  ;;  %v195_v48 = vld [vmem:[%s685_s5 + $0xd0] sm:$0xff]  ;;  %v178_v49 = vld [vmem:[%s685_s5 + $0x48] sm:$0xff] }
  0x1c   :  { %154 = vmatpush.msra.mxu2 %v106_v20  ;;  %207 = vmatpush.msra.mxu3 %v182_v40  ;;  %v194_v50 = vld [vmem:[%s685_s5 + $0xc8] sm:$0xff]  ;;  %v177_v51 = vld [vmem:[%s685_s5 + $0x40] sm:$0xff]  ;;  %v176_v53 = vld [vmem:[%s685_s5 + $0x38] sm:$0xff] }
  0x1d   :  { %135 = vmatpush.msra.mxu1 %v103_v21  ;;  %227 = vmatpush.msrb.mxu0 %v198_v42  ;;  %v193_v52 = vld [vmem:[%s685_s5 + $0xc0] sm:$0xff]  ;;  %v192_v54 = vld [vmem:[%s685_s5 + $0xb8] sm:$0xff]  ;;  %v175_v55 = vld [vmem:[%s685_s5 + $0x30] sm:$0xff] }
  0x1e   :  { %155 = vmatpush.msra.mxu2 %v104_v22  ;;  %208 = vmatpush.msra.mxu3 %v181_v43  ;;  %v191_v56 = vld [vmem:[%s685_s5 + $0xb0] sm:$0xff]  ;;  %v174_v57 = vld [vmem:[%s685_s5 + $0x28] sm:$0xff]  ;;  %v173_v58 = vld [vmem:[%s685_s5 + $0x20] sm:$0xff] }
  0x1f   :  { %136 = vmatpush.msra.mxu1 %v101_v23  ;;  %228 = vmatpush.msrb.mxu0 %v197_v44  ;;  %v172_v59 = vld [vmem:[%s685_s5 + $0x18] sm:$0xff]  ;;  %v326_v60 = vld [vmem:[#allocation2] ss:$0 sm:$0xff]  ;;  %v171_v0 = vld [vmem:[%s685_s5 + $0x10] sm:$0xff] }
  0x20   :  { %156 = vmatpush.msra.mxu2 %v102_v24  ;;  %209 = vmatpush.msra.mxu3 %v180_v45  ;;  %v190_v1 = vld [vmem:[%s685_s5 + $0xa8] sm:$0xff]  ;;  %v189_v3 = vld [vmem:[%s685_s5 + $0xa0] sm:$0xff]  ;;  %v188_v5 = vld [vmem:[%s685_s5 + $0x98] sm:$0xff] }
  0x21   :  { %137 = vmatpush.msra.mxu1 %v99_v25  ;;  %229 = vmatpush.msrb.mxu0 %v196_v46  ;;  %v170_v2 = vld [vmem:[%s685_s5 + $0x8] sm:$0xff]  ;;  %v169_v4 = vld [vmem:[%s685_s5] sm:$0xff]  ;;  %v187_v6 = vld [vmem:[%s685_s5 + $0x90] sm:$0xff] }
  0x22   :  { %157 = vmatpush.msra.mxu2 %v100_v26  ;;  %210 = vmatpush.msra.mxu3 %v179_v47  ;;  %v186_v7 = vld [vmem:[%s685_s5 + $0x88] sm:$0xff]  ;;  %v185_v8 = vld [vmem:[%s685_s5 + $0x80] sm:$0xff]  ;;  %s416_s5 = smov 120  }
  0x23   :  { %138 = vmatpush.msra.mxu1 %v97_v27  ;;  %230 = vmatpush.msrb.mxu0 %v195_v48  ;;  %v121_v9 = vld [vmem:[#allocation5] sm:$0x3]  ;;  %v327_v18 = vld [vmem:[%s686_s6] ss:$0 sm:$0xff]  ;;  %s417_s6 = smov [#allocation7]  }
  0x24   :  { %158 = vmatpush.msra.mxu2 %v98_v28  ;;  %211 = vmatpush.msra.mxu3 %v178_v49  ;;  %v123_v10 = vperm.slane %v121_v9, 0  ;;  %v124_v14 = vperm.slane %v121_v9, 1  ;;  %s308_s12 = sshll.u32 %s417_s6, 4  ;;  %s309_s12 = int_to_ptr.vmem [resolvable:$true] %s308_s12 }
  0x25   :  { %139 = vmatpush.msra.mxu1 %v95_v29  ;;  %231 = vmatpush.msrb.mxu0 %v194_v50 }
  0x26   :  { %159 = vmatpush.msra.mxu2 %v96_v30  ;;  %212 = vmatpush.msra.mxu3 %v177_v51 }
  0x27   :  { %140 = vmatpush.msra.mxu1 %v93_v31  ;;  %232 = vmatpush.msrb.mxu0 %v193_v52 }
  0x28   :  { %160 = vmatpush.msra.mxu2 %v94_v32  ;;  %213 = vmatpush.msra.mxu3 %v176_v53 }
  0x29   :  { %141 = vmatpush.msra.mxu1 %v91_v33  ;;  %233 = vmatpush.msrb.mxu0 %v192_v54 }
  0x2a   :  { %161 = vmatpush.msra.mxu2 %v92_v34  ;;  %214 = vmatpush.msra.mxu3 %v175_v55 }
  0x2b   :  { %142 = vmatpush.msra.mxu1 %v89_v35  ;;  %234 = vmatpush.msrb.mxu0 %v191_v56 }
  0x2c   :  { %162 = vmatpush.msra.mxu2 %v90_v36  ;;  %215 = vmatpush.msra.mxu3 %v174_v57 }
  0x2d   :  { %235 = vmatpush.msrb.mxu0 %v190_v1 }
  0x2e   :  { %216 = vmatpush.msra.mxu3 %v173_v58 }
  0x2f   :  { %236 = vmatpush.msrb.mxu0 %v189_v3 }
  0x30   :  { %217 = vmatpush.msra.mxu3 %v172_v59 }
  0x31   :  { %237 = vmatpush.msrb.mxu0 %v188_v5 }
  0x32   :  { %218 = vmatpush.msra.mxu3 %v171_v0 }
  0x33   :  { %238 = vmatpush.msrb.mxu0 %v187_v6 }
  0x34   :  { %219 = vmatpush.msra.mxu3 %v170_v2 }
  0x35   :  { %239 = vmatpush.msrb.mxu0 %v186_v7 }
  0x36   :  { %220 = vmatpush.msra.mxu3 %v169_v4 }
  0x37   :  { %240 = vmatpush.msrb.mxu0 %v185_v8 }
  0x90   :  { %v85_v61 = vpop.f32.mrf.mxu0 }
  0x91   :  { %v86_v62 = vadd.f32 %v326_v60, %v85_v61 }
  0x93   :  { %v88_v63 = vmax.f32 %v86_v62, 0.0 }
  0x95   :  { %143 = vmatmul.f32.vlgmr.msra.gmra.mxu1 %v88_v63  ;;  %163 = vmatmul.f32.vlgmr.msra.gmra.mxu2 %v88_v63 }
 0x112   :  { %v144_v11 = vpop.f32.mrf.mxu1 }
 0x113   :  { %v145_v12 = vadd.f32 %v144_v11, %v123_v10 }
 0x115   :  { %v167_v13 = vmax.f32 %v145_v12, 0.0 }
 0x117   :  { %221 = vmatmul.f32.vlgmr.msra.gmra.mxu3 %v167_v13 }
 0x118   :  { %v164_v15 = vpop.f32.mrf.mxu2 }
 0x119   :  { %v165_v16 = vadd.f32 %v164_v15, %v124_v14 }
 0x11b   :  { %v168_v17 = vmax.f32 %v165_v16, 0.0 }
 0x11d   :  { %241 = vmatmul.f32.vlgmr.msrb.gmra.mxu0 %v168_v17 }
 0x19a   :  { %v222_v19 = vpop.f32.mrf.mxu3  ;;  %v242_v21 = vpop.f32.mrf.mxu0 }
 0x19b   :  { %v223_v20 = vadd.f32 %v327_v18, %v222_v19 }
 0x19d   :  { %v243_v22 = vadd.f32 %v242_v21, %v223_v20 }
 0x19f   :  { %v271_v23 = vsel %vm270_vm1, %v243_v22, -inf  ;;  %v246_v24 = vsel %vm245_vm2, %v243_v22, -inf }
 0x1a0   :  { %272 = vmax.xlane.f32.xlu0 %v271_v23 }
 0x1a8   :  { %247 = vmax.xlane.f32.xlu0 %v246_v24 }
 0x213   :  { %v273_v25 = vpop.xlane.xlu0 %272 }
 0x214   :  { %v274_v26 = vsub.f32 %v243_v22, %v273_v25 }
 0x216   :  { %v275_v27 = vmul.f32 1.442695, %v274_v26 }
 0x218   :  { %328 = vpow2.f32 %v275_v27 }
 0x21b   :  { %v248_v29 = vpop.xlane.xlu0 %247 }
 0x21c   :  { %v249_v30 = vsub.f32 %v243_v22, %v248_v29 }
 0x21e   :  { %v329_v28 = vpop.eup %328  ;;  %v250_v31 = vmul.f32 1.442695, %v249_v30 }
 0x21f   :  { %278 = vrot.lane.b32.xlu1 %v329_v28, %s416_s5 }
 0x220   :  { %330 = vpow2.f32 %v250_v31 }
 0x226   :  { %v331_v32 = vpop.eup %330 }
 0x227   :  { %v252_v33 = vsel %vm245_vm2, %v331_v32, 0.0 }
 0x249   :  { %253 = vadd.xlane.f32.xlu1 %v252_v33 }
 0x291   :  { %v279_v34 = vpop.permute.xlu1 %278 }
 0x292   :  { %v281_v35 = vsel %vm245_vm2, %v279_v34, 0.0 }
 0x293   :  { %282 = vadd.xlane.f32.xlu2 %v281_v35 }
 0x2bc   :  { %v254_v36 = vpop.xlane.xlu1 %253 }
 0x2bd   :  { %332 = vrcp.f32 %v254_v36  ;;  %v266_v45 = vand.u32 2147483648, %v254_v36  ;;  %vm260_vm4 = vweird.f32 %v254_v36  ;;  %v264_v46 = vand.u32 2147483647, %v254_v36 }
 0x2bf   :  { %v267_v52 = vor.u32 1.1754944e-38, %v266_v45  ;;  %vm265_vm7 = vcmp.eq.f32.partialorder %v264_v46, 8.507059e+37 }
 0x2c3   :  { %v333_v37 = vpop.eup %332 }
 0x2c4   :  { %v256_v38 = vmul.f32 %v333_v37, %v254_v36  ;;  %vm261_vm3 = vweird.f32 %v333_v37 }
 0x2c5   :  { %vm262_vm5 = vmor %vm260_vm4, %vm261_vm3 }
 0x2c6   :  { %v257_v39 = vsub.f32 1.0, %v256_v38 }
 0x2c8   :  { %v258_v41 = vmul.f32 %v333_v37, %v257_v39 }
 0x2ca   :  { %v259_v43 = vadd.f32 %v333_v37, %v258_v41 }
 0x2cc   :  { %v263_v49 = vsel %vm262_vm5, %v333_v37, %v259_v43 }
 0x2cd   :  { %v268_v54 = vsel %vm265_vm7, %v267_v52, %v263_v49 }
 0x2ce   :  { %v269_v58 = vmul.f32 %v331_v32, %v268_v54 }
 0x306   :  { %v283_v40 = vpop.xlane.xlu2 %282 }
 0x307   :  { %334 = vrcp.f32 %v283_v40  ;;  %v295_v48 = vand.u32 2147483648, %v283_v40  ;;  %v293_v51 = vand.u32 2147483647, %v283_v40  ;;  %vm289_vm8 = vweird.f32 %v283_v40 }
 0x309   :  { %v296_v55 = vor.u32 1.1754944e-38, %v295_v48  ;;  %vm294_vm10 = vcmp.eq.f32.partialorder %v293_v51, 8.507059e+37 }
 0x30d   :  { %v335_v42 = vpop.eup %334 }
 0x30e   :  { %v285_v44 = vmul.f32 %v335_v42, %v283_v40  ;;  %vm290_vm6 = vweird.f32 %v335_v42 }
 0x30f   :  { %vm291_vm9 = vmor %vm289_vm8, %vm290_vm6 }
 0x310   :  { %v286_v47 = vsub.f32 1.0, %v285_v44 }
 0x312   :  { %v287_v50 = vmul.f32 %v335_v42, %v286_v47 }
 0x314   :  { %v288_v53 = vadd.f32 %v335_v42, %v287_v50 }
 0x316   :  { %v292_v56 = vsel %vm291_vm9, %v335_v42, %v288_v53 }
 0x317   :  { %v297_v57 = vsel %vm294_vm10, %v296_v55, %v292_v56 }
 0x318   :  { %v298_v59 = vmul.f32 %v329_v28, %v297_v57 }
 0x31a   :  { %v300_v60 = vsel %vm299_vm11, %v269_v58, %v298_v59 }
 0x31b   :  { %302 = vst.msk [vmem:[#allocation7] sm:$0x3] %vm301_vm12, %v300_v60 }
 0x31c   :  { %313 = dma.vmem_to_hbm [thread:$0]  %s309_s12, 32, %s311_s14, [#allocation4]  }
 0x31d   :  { %412 = dma.done.wait [#allocation4], 32  }
 0x31e   :  { %413 = vsyncadd [#allocation4], 4294967264 }
 0x31f   :  { %318 = vsyncpa [#allocation3], 1 }
 0x320   :  { %319 = vsyncpa [#allocation6], 1 }
 0x321   :  { %320 = vsyncpa [#allocation4], 1 }

</bundles_post_ra>
